<compile_context>
chip_gen: v5e
topology: v5e:2x2
jax: 0.10.0
libtpu: 0.0.40
codegen_flags: <defaults>
</compile_context>

<pallas_src>
import jax
import jax.numpy as jnp
from jax.experimental import pallas as pl
from jax.experimental.pallas import tpu as pltpu

HIDDEN = 32
FC1 = 16


def _pick_t_chunk(T, cap=64):
    """Largest multiple-of-8 divisor of T (<= cap); falls back to whole T."""
    best = None
    for c in range(8, min(T, cap) + 1, 8):
        if T % c == 0:
            best = c
    return best if best is not None else T


def lstm_reload_kernel(x_ref, wih_ref, whh_ref, b_ref,
                       w1_ref, b1_ref, w2_ref, b2_ref,
                       out_ref, h_ref, c_ref, gx_ref):
    """One grid step = one time-chunk of the recurrence.

    x_ref  : (B, TC, D)   batch-first chunk of the input
    wih_ref: (D, 4H)      transposed weight_ih
    whh_ref: (H, 4H)      transposed weight_hh
    b_ref  : (1, 4H)      bias_ih + bias_hh
    w1_ref : (H, FC1), b1_ref: (1, FC1)
    w2_ref : (1, FC1)     final projection as a row (lane reduction)
    b2_ref : (1, 1)
    out_ref: (B, 1)       written only on the last chunk
    h_ref, c_ref : (B, H) persistent LSTM state (VMEM scratch)
    gx_ref : (B*TC, 4H)   hoisted per-chunk input projection (VMEM scratch)
    """
    t_blk = pl.program_id(0)
    B, TC, D = x_ref.shape
    H = whh_ref.shape[0]

    @pl.when(t_blk == 0)
    def _init():
        h_ref[...] = jnp.zeros_like(h_ref)
        c_ref[...] = jnp.zeros_like(c_ref)

    # --- Hoisted input projection: ONE MXU matmul for the whole chunk, bias
    #     folded in.  Row order of gx is b*TC + t.
    x_flat = x_ref[...].reshape(B * TC, D)
    gx_ref[...] = (jnp.dot(x_flat, wih_ref[...],
                           preferred_element_type=jnp.float32)
                   + b_ref[...])

    whh = whh_ref[...]
    h = h_ref[...]
    c = c_ref[...]

    # --- Recurrence, fully unrolled over the static chunk length.  Only the
    #     h @ Whh matmul sits on the serial dependence chain.
    for t in range(TC):
        # Rows {b*TC + t : b in [0, B)} of the precomputed projection:
        # a strided sublane load from the scratch ref.
        gx_t = gx_ref[pl.ds(t, B, stride=TC), :]
        g = gx_t + jnp.dot(h, whh, preferred_element_type=jnp.float32)
        # PyTorch LSTM gate order: i, f, g, o
        i_g = jax.nn.sigmoid(g[:, 0 * H:1 * H])
        f_g = jax.nn.sigmoid(g[:, 1 * H:2 * H])
        g_g = jnp.tanh(g[:, 2 * H:3 * H])
        o_g = jax.nn.sigmoid(g[:, 3 * H:4 * H])
        c = f_g * c + i_g * g_g
        h = o_g * jnp.tanh(c)

    h_ref[...] = h
    c_ref[...] = c

    # --- MLP head, only on the final chunk.
    @pl.when(t_blk == pl.num_programs(0) - 1)
    def _head():
        z = jnp.maximum(h, 0.0)
        z = jnp.dot(z, w1_ref[...], preferred_element_type=jnp.float32) + b1_ref[...]
        z = jnp.maximum(z, 0.0)
        # (B,16)@(16,1) replaced by a lane reduction (avoids an N=1 MXU pass).
        y = jnp.sum(z * w2_ref[...], axis=-1, keepdims=True) + b2_ref[...]
        out_ref[...] = jax.nn.sigmoid(y)


def init_params(key, input_size):
    """Deterministic param init matching the PyTorch module's shapes."""
    ks = jax.random.split(key, 8)
    k_lstm = 1.0 / jnp.sqrt(HIDDEN)
    w_ih = jax.random.uniform(ks[0], (4 * HIDDEN, input_size), jnp.float32, -k_lstm, k_lstm)
    w_hh = jax.random.uniform(ks[1], (4 * HIDDEN, HIDDEN), jnp.float32, -k_lstm, k_lstm)
    b_ih = jax.random.uniform(ks[2], (4 * HIDDEN,), jnp.float32, -k_lstm, k_lstm)
    b_hh = jax.random.uniform(ks[3], (4 * HIDDEN,), jnp.float32, -k_lstm, k_lstm)
    k1 = 1.0 / jnp.sqrt(HIDDEN)
    w1 = jax.random.uniform(ks[4], (FC1, HIDDEN), jnp.float32, -k1, k1)
    b1 = jax.random.uniform(ks[5], (FC1,), jnp.float32, -k1, k1)
    k2 = 1.0 / jnp.sqrt(FC1)
    w2 = jax.random.uniform(ks[6], (1, FC1), jnp.float32, -k2, k2)
    b2 = jax.random.uniform(ks[7], (1,), jnp.float32, -k2, k2)
    return dict(w_ih=w_ih, w_hh=w_hh, b_ih=b_ih, b_hh=b_hh,
                w1=w1, b1=b1, w2=w2, b2=b2)


def lstm_reload_net(x_btd, params, *, t_chunk=None):
    """x_btd: (B, T, D) batch_first, like the PyTorch module.  Returns (B, 1)."""
    B, T, D = x_btd.shape
    H = HIDDEN
    tc = t_chunk if t_chunk is not None else _pick_t_chunk(T)
    assert T % tc == 0, (T, tc)
    n_blk = T // tc

    x = x_btd.astype(jnp.float32)
    wih_t = params["w_ih"].T.astype(jnp.float32)                     # (D, 4H)
    whh_t = params["w_hh"].T.astype(jnp.float32)                     # (H, 4H)
    b = (params["b_ih"] + params["b_hh"]).reshape(1, 4 * H).astype(jnp.float32)
    w1_t = params["w1"].T.astype(jnp.float32)                        # (H, FC1)
    b1 = params["b1"].reshape(1, FC1).astype(jnp.float32)
    w2_row = params["w2"].reshape(1, FC1).astype(jnp.float32)        # row for lane reduction
    b2 = params["b2"].reshape(1, 1).astype(jnp.float32)

    # Advisory cost estimate for the XLA scheduler around the custom call.
    flops = (2 * T * B * D * 4 * H        # hoisted input projection
             + 2 * T * B * H * 4 * H      # recurrent matmuls
             + 10 * T * B * 4 * H         # gate elementwise (approx)
             + 2 * B * H * FC1 + 2 * B * FC1)
    transcendentals = 5 * T * B * H + B
    bytes_accessed = 4 * (x.size + wih_t.size + whh_t.size + b.size
                          + w1_t.size + b1.size + w2_row.size + b2.size + B)

    grid_spec = pltpu.PrefetchScalarGridSpec(
        num_scalar_prefetch=0,
        grid=(n_blk,),
        in_specs=[
            pl.BlockSpec((B, tc, D), lambda i: (0, i, 0)),     # x: streamed T-chunks
            pl.BlockSpec((D, 4 * H), lambda i: (0, 0)),        # Wih^T (resident)
            pl.BlockSpec((H, 4 * H), lambda i: (0, 0)),        # Whh^T (resident)
            pl.BlockSpec((1, 4 * H), lambda i: (0, 0)),        # bias
            pl.BlockSpec((H, FC1), lambda i: (0, 0)),          # W1^T
            pl.BlockSpec((1, FC1), lambda i: (0, 0)),          # b1
            pl.BlockSpec((1, FC1), lambda i: (0, 0)),          # W2 row
            pl.BlockSpec((1, 1), lambda i: (0, 0)),            # b2
        ],
        out_specs=pl.BlockSpec((B, 1), lambda i: (0, 0)),
        scratch_shapes=[
            pltpu.VMEM((B, H), jnp.float32),            # h state (persists across chunks)
            pltpu.VMEM((B, H), jnp.float32),            # c state
            pltpu.VMEM((B * tc, 4 * H), jnp.float32),   # hoisted per-chunk gate pre-acts
        ],
    )

    return pl.pallas_call(
        lstm_reload_kernel,
        out_shape=jax.ShapeDtypeStruct((B, 1), jnp.float32),
        grid_spec=grid_spec,
        compiler_params=pltpu.CompilerParams(
            dimension_semantics=("arbitrary",),     # time chunks are sequential (recurrence)
            vmem_limit_bytes=32 * 1024 * 1024,
        ),
        cost_estimate=pl.CostEstimate(
            flops=flops,
            transcendentals=transcendentals,
            bytes_accessed=bytes_accessed,
        ),
    )(x, wih_t, whh_t, b, w1_t, b1, w2_row, b2)


def reference_forward(x_btd, params):
    """Pure-JAX reference replicating the PyTorch forward semantics."""
    B, T, D = x_btd.shape
    h = jnp.zeros((B, HIDDEN), jnp.float32)
    c = jnp.zeros((B, HIDDEN), jnp.float32)
    for t in range(T):
        gates = (x_btd[:, t, :] @ params["w_ih"].T
                 + h @ params["w_hh"].T
                 + params["b_ih"] + params["b_hh"])
        i_g = jax.nn.sigmoid(gates[:, 0 * HIDDEN:1 * HIDDEN])
        f_g = jax.nn.sigmoid(gates[:, 1 * HIDDEN:2 * HIDDEN])
        g_g = jnp.tanh(gates[:, 2 * HIDDEN:3 * HIDDEN])
        o_g = jax.nn.sigmoid(gates[:, 3 * HIDDEN:4 * HIDDEN])
        c = f_g * c + i_g * g_g
        h = o_g * jnp.tanh(c)
    z = jnp.maximum(h, 0.0)
    z = jnp.maximum(z @ params["w1"].T + params["b1"], 0.0)
    return jax.nn.sigmoid(z @ params["w2"].T + params["b2"])


if __name__ == "__main__":
    B, T, D = 2, 8, 16
    key = jax.random.PRNGKey(0)
    k_x, k_p = jax.random.split(key)
    x = jax.random.normal(k_x, (B, T, D), jnp.float32)
    params = init_params(k_p, D)

    fwd = jax.jit(lstm_reload_net)
    out = jax.block_until_ready(fwd(x, params))

    ref = jax.block_until_ready(reference_forward(x, params))
    assert out.shape == (B, 1), out.shape
    assert jnp.allclose(out, ref, atol=1e-5, rtol=1e-5), (out, ref)
    print("KERNEL_OK")
</pallas_src>

<mosaic_0001>
module attributes {stable_mosaic.version = 11 : i64} {
  func.func @lstm_reload_kernel(%arg0: i32, %arg1: memref<2x8x16xf32, #tpu.memory_space<vmem>>, %arg2: memref<16x128xf32, #tpu.memory_space<vmem>>, %arg3: memref<32x128xf32, #tpu.memory_space<vmem>>, %arg4: memref<1x128xf32, #tpu.memory_space<vmem>>, %arg5: memref<32x16xf32, #tpu.memory_space<vmem>>, %arg6: memref<1x16xf32, #tpu.memory_space<vmem>>, %arg7: memref<1x16xf32, #tpu.memory_space<vmem>>, %arg8: memref<1x1xf32, #tpu.memory_space<vmem>>, %arg9: memref<2x1xf32, #tpu.memory_space<vmem>>, %arg10: memref<2x32xf32, #tpu.memory_space<vmem>>, %arg11: memref<2x32xf32, #tpu.memory_space<vmem>>, %arg12: memref<16x128xf32, #tpu.memory_space<vmem>>) attributes {dimension_semantics = [#tpu.dimension_semantics<arbitrary>], iteration_bounds = array<i64: 1>, scalar_prefetch = 0 : i64, scratch_operands = 3 : i64, tpu.core_type = #tpu.core_type<tc>, window_params = [{transform_indices = @transform_0, window_bounds = array<i64: 2, 8, 16>}, {pipeline_mode = #tpu.pipeline_mode<synchronous>, transform_indices = @transform_1, window_bounds = array<i64: 16, 128>}, {pipeline_mode = #tpu.pipeline_mode<synchronous>, transform_indices = @transform_2, window_bounds = array<i64: 32, 128>}, {pipeline_mode = #tpu.pipeline_mode<synchronous>, transform_indices = @transform_3, window_bounds = array<i64: 1, 128>}, {pipeline_mode = #tpu.pipeline_mode<synchronous>, transform_indices = @transform_4, window_bounds = array<i64: 32, 16>}, {pipeline_mode = #tpu.pipeline_mode<synchronous>, transform_indices = @transform_5, window_bounds = array<i64: 1, 16>}, {pipeline_mode = #tpu.pipeline_mode<synchronous>, transform_indices = @transform_6, window_bounds = array<i64: 1, 16>}, {pipeline_mode = #tpu.pipeline_mode<synchronous>, transform_indices = @transform_7, window_bounds = array<i64: 1, 1>}, {pipeline_mode = #tpu.pipeline_mode<synchronous>, transform_indices = @transform_8, window_bounds = array<i64: 2, 1>}]} {
    %c0_i32 = arith.constant 0 : i32
    %0 = arith.cmpi eq, %arg0, %c0_i32 : i32
    %1 = arith.extui %0 : i1 to i32
    %c0_i32_0 = arith.constant 0 : i32
    %2 = arith.cmpi ne, %1, %c0_i32_0 : i32
    scf.if %2 {
      %cst_62 = arith.constant 0.000000e+00 : f32
      %243 = vector.broadcast %cst_62 : f32 to vector<2x32xf32>
      %c0_63 = arith.constant 0 : index
      %c0_64 = arith.constant 0 : index
      %244 = vector.load %arg10[%c0_63, %c0_64] : memref<2x32xf32, #tpu.memory_space<vmem>>, vector<2x32xf32>
      tpu.vector_store %arg10[%c0_63, %c0_64], %243 {strides = array<i32>} : memref<2x32xf32, #tpu.memory_space<vmem>>, vector<2x32xf32>,
      %cst_65 = arith.constant 0.000000e+00 : f32
      %245 = vector.broadcast %cst_65 : f32 to vector<2x32xf32>
      %c0_66 = arith.constant 0 : index
      %c0_67 = arith.constant 0 : index
      %246 = vector.load %arg11[%c0_66, %c0_67] : memref<2x32xf32, #tpu.memory_space<vmem>>, vector<2x32xf32>
      tpu.vector_store %arg11[%c0_66, %c0_67], %245 {strides = array<i32>} : memref<2x32xf32, #tpu.memory_space<vmem>>, vector<2x32xf32>,
    } else {
    }
    %c0 = arith.constant 0 : index
    %c0_1 = arith.constant 0 : index
    %c0_2 = arith.constant 0 : index
    %3 = vector.load %arg1[%c0, %c0_1, %c0_2] : memref<2x8x16xf32, #tpu.memory_space<vmem>>, vector<2x8x16xf32>
    %4 = vector.shape_cast %3 : vector<2x8x16xf32> to vector<16x16xf32>
    %c0_3 = arith.constant 0 : index
    %c0_4 = arith.constant 0 : index
    %5 = vector.load %arg2[%c0_3, %c0_4] : memref<16x128xf32, #tpu.memory_space<vmem>>, vector<16x128xf32>
    %cst = arith.constant dense<0.000000e+00> : vector<16x128xf32>
    %6 = tpu.matmul %4, %5, %cst {dimension_numbers = #tpu.dot_dimension_numbers<[1], [0], [0], [1], [0, 0, 1, 1], [], []>} : vector<16x16xf32>, vector<16x128xf32>, vector<16x128xf32> -> vector<16x128xf32>
    %c0_5 = arith.constant 0 : index
    %c0_6 = arith.constant 0 : index
    %7 = vector.load %arg4[%c0_5, %c0_6] : memref<1x128xf32, #tpu.memory_space<vmem>>, vector<1x128xf32>
    %8 = vector.broadcast %7 : vector<1x128xf32> to vector<16x128xf32>
    %9 = arith.addf %6, %8 : vector<16x128xf32>
    %c0_7 = arith.constant 0 : index
    %c0_8 = arith.constant 0 : index
    %10 = vector.load %arg12[%c0_7, %c0_8] : memref<16x128xf32, #tpu.memory_space<vmem>>, vector<16x128xf32>
    tpu.vector_store %arg12[%c0_7, %c0_8], %9 {strides = array<i32>} : memref<16x128xf32, #tpu.memory_space<vmem>>, vector<16x128xf32>,
    %c0_9 = arith.constant 0 : index
    %c0_10 = arith.constant 0 : index
    %11 = vector.load %arg3[%c0_9, %c0_10] : memref<32x128xf32, #tpu.memory_space<vmem>>, vector<32x128xf32>
    %c0_11 = arith.constant 0 : index
    %c0_12 = arith.constant 0 : index
    %12 = vector.load %arg10[%c0_11, %c0_12] : memref<2x32xf32, #tpu.memory_space<vmem>>, vector<2x32xf32>
    %c0_13 = arith.constant 0 : index
    %c0_14 = arith.constant 0 : index
    %13 = vector.load %arg11[%c0_13, %c0_14] : memref<2x32xf32, #tpu.memory_space<vmem>>, vector<2x32xf32>
    %c0_15 = arith.constant 0 : index
    %c0_16 = arith.constant 0 : index
    %14 = tpu.strided_load %arg12[%c0_15, %c0_16] {strides = array<i32: 8, 1>} : memref<16x128xf32, #tpu.memory_space<vmem>>, vector<2x128xf32>
    %cst_17 = arith.constant dense<0.000000e+00> : vector<2x128xf32>
    %15 = tpu.matmul %12, %11, %cst_17 {dimension_numbers = #tpu.dot_dimension_numbers<[1], [0], [0], [1], [0, 0, 1, 1], [], []>} : vector<2x32xf32>, vector<32x128xf32>, vector<2x128xf32> -> vector<2x128xf32>
    %16 = arith.addf %14, %15 : vector<2x128xf32>
    %17 = vector.extract_strided_slice %16 {offsets = [0, 0], sizes = [2, 32], strides = [1, 1]} : vector<2x128xf32> to vector<2x32xf32>
    %18 = arith.negf %17 : vector<2x32xf32>
    %19 = math.exp %18 : vector<2x32xf32>
    %cst_18 = arith.constant 1.000000e+00 : f32
    %20 = vector.broadcast %cst_18 : f32 to vector<2x32xf32>
    %21 = arith.addf %20, %19 : vector<2x32xf32>
    %22 = arith.divf %20, %21 : vector<2x32xf32>
    %23 = vector.extract_strided_slice %16 {offsets = [0, 32], sizes = [2, 32], strides = [1, 1]} : vector<2x128xf32> to vector<2x32xf32>
    %24 = arith.negf %23 : vector<2x32xf32>
    %25 = math.exp %24 : vector<2x32xf32>
    %cst_19 = arith.constant 1.000000e+00 : f32
    %26 = vector.broadcast %cst_19 : f32 to vector<2x32xf32>
    %27 = arith.addf %26, %25 : vector<2x32xf32>
    %28 = arith.divf %26, %27 : vector<2x32xf32>
    %29 = vector.extract_strided_slice %16 {offsets = [0, 64], sizes = [2, 32], strides = [1, 1]} : vector<2x128xf32> to vector<2x32xf32>
    %30 = math.tanh %29 : vector<2x32xf32>
    %31 = vector.extract_strided_slice %16 {offsets = [0, 96], sizes = [2, 32], strides = [1, 1]} : vector<2x128xf32> to vector<2x32xf32>
    %32 = arith.negf %31 : vector<2x32xf32>
    %33 = math.exp %32 : vector<2x32xf32>
    %cst_20 = arith.constant 1.000000e+00 : f32
    %34 = vector.broadcast %cst_20 : f32 to vector<2x32xf32>
    %35 = arith.addf %34, %33 : vector<2x32xf32>
    %36 = arith.divf %34, %35 : vector<2x32xf32>
    %37 = arith.mulf %28, %13 : vector<2x32xf32>
    %38 = arith.mulf %22, %30 : vector<2x32xf32>
    %39 = arith.addf %37, %38 : vector<2x32xf32>
    %40 = math.tanh %39 : vector<2x32xf32>
    %41 = arith.mulf %36, %40 : vector<2x32xf32>
    %c1 = arith.constant 1 : index
    %c0_21 = arith.constant 0 : index
    %42 = tpu.strided_load %arg12[%c1, %c0_21] {strides = array<i32: 8, 1>} : memref<16x128xf32, #tpu.memory_space<vmem>>, vector<2x128xf32>
    %cst_22 = arith.constant dense<0.000000e+00> : vector<2x128xf32>
    %43 = tpu.matmul %41, %11, %cst_22 {dimension_numbers = #tpu.dot_dimension_numbers<[1], [0], [0], [1], [0, 0, 1, 1], [], []>} : vector<2x32xf32>, vector<32x128xf32>, vector<2x128xf32> -> vector<2x128xf32>
    %44 = arith.addf %42, %43 : vector<2x128xf32>
    %45 = vector.extract_strided_slice %44 {offsets = [0, 0], sizes = [2, 32], strides = [1, 1]} : vector<2x128xf32> to vector<2x32xf32>
    %46 = arith.negf %45 : vector<2x32xf32>
    %47 = math.exp %46 : vector<2x32xf32>
    %cst_23 = arith.constant 1.000000e+00 : f32
    %48 = vector.broadcast %cst_23 : f32 to vector<2x32xf32>
    %49 = arith.addf %48, %47 : vector<2x32xf32>
    %50 = arith.divf %48, %49 : vector<2x32xf32>
    %51 = vector.extract_strided_slice %44 {offsets = [0, 32], sizes = [2, 32], strides = [1, 1]} : vector<2x128xf32> to vector<2x32xf32>
    %52 = arith.negf %51 : vector<2x32xf32>
    %53 = math.exp %52 : vector<2x32xf32>
    %cst_24 = arith.constant 1.000000e+00 : f32
    %54 = vector.broadcast %cst_24 : f32 to vector<2x32xf32>
    %55 = arith.addf %54, %53 : vector<2x32xf32>
    %56 = arith.divf %54, %55 : vector<2x32xf32>
    %57 = vector.extract_strided_slice %44 {offsets = [0, 64], sizes = [2, 32], strides = [1, 1]} : vector<2x128xf32> to vector<2x32xf32>
    %58 = math.tanh %57 : vector<2x32xf32>
    %59 = vector.extract_strided_slice %44 {offsets = [0, 96], sizes = [2, 32], strides = [1, 1]} : vector<2x128xf32> to vector<2x32xf32>
    %60 = arith.negf %59 : vector<2x32xf32>
    %61 = math.exp %60 : vector<2x32xf32>
    %cst_25 = arith.constant 1.000000e+00 : f32
    %62 = vector.broadcast %cst_25 : f32 to vector<2x32xf32>
    %63 = arith.addf %62, %61 : vector<2x32xf32>
    %64 = arith.divf %62, %63 : vector<2x32xf32>
    %65 = arith.mulf %56, %39 : vector<2x32xf32>
    %66 = arith.mulf %50, %58 : vector<2x32xf32>
    %67 = arith.addf %65, %66 : vector<2x32xf32>
    %68 = math.tanh %67 : vector<2x32xf32>
    %69 = arith.mulf %64, %68 : vector<2x32xf32>
    %c2 = arith.constant 2 : index
    %c0_26 = arith.constant 0 : index
    %70 = tpu.strided_load %arg12[%c2, %c0_26] {strides = array<i32: 8, 1>} : memref<16x128xf32, #tpu.memory_space<vmem>>, vector<2x128xf32>
    %cst_27 = arith.constant dense<0.000000e+00> : vector<2x128xf32>
    %71 = tpu.matmul %69, %11, %cst_27 {dimension_numbers = #tpu.dot_dimension_numbers<[1], [0], [0], [1], [0, 0, 1, 1], [], []>} : vector<2x32xf32>, vector<32x128xf32>, vector<2x128xf32> -> vector<2x128xf32>
    %72 = arith.addf %70, %71 : vector<2x128xf32>
    %73 = vector.extract_strided_slice %72 {offsets = [0, 0], sizes = [2, 32], strides = [1, 1]} : vector<2x128xf32> to vector<2x32xf32>
    %74 = arith.negf %73 : vector<2x32xf32>
    %75 = math.exp %74 : vector<2x32xf32>
    %cst_28 = arith.constant 1.000000e+00 : f32
    %76 = vector.broadcast %cst_28 : f32 to vector<2x32xf32>
    %77 = arith.addf %76, %75 : vector<2x32xf32>
    %78 = arith.divf %76, %77 : vector<2x32xf32>
    %79 = vector.extract_strided_slice %72 {offsets = [0, 32], sizes = [2, 32], strides = [1, 1]} : vector<2x128xf32> to vector<2x32xf32>
    %80 = arith.negf %79 : vector<2x32xf32>
    %81 = math.exp %80 : vector<2x32xf32>
    %cst_29 = arith.constant 1.000000e+00 : f32
    %82 = vector.broadcast %cst_29 : f32 to vector<2x32xf32>
    %83 = arith.addf %82, %81 : vector<2x32xf32>
    %84 = arith.divf %82, %83 : vector<2x32xf32>
    %85 = vector.extract_strided_slice %72 {offsets = [0, 64], sizes = [2, 32], strides = [1, 1]} : vector<2x128xf32> to vector<2x32xf32>
    %86 = math.tanh %85 : vector<2x32xf32>
    %87 = vector.extract_strided_slice %72 {offsets = [0, 96], sizes = [2, 32], strides = [1, 1]} : vector<2x128xf32> to vector<2x32xf32>
    %88 = arith.negf %87 : vector<2x32xf32>
    %89 = math.exp %88 : vector<2x32xf32>
    %cst_30 = arith.constant 1.000000e+00 : f32
    %90 = vector.broadcast %cst_30 : f32 to vector<2x32xf32>
    %91 = arith.addf %90, %89 : vector<2x32xf32>
    %92 = arith.divf %90, %91 : vector<2x32xf32>
    %93 = arith.mulf %84, %67 : vector<2x32xf32>
    %94 = arith.mulf %78, %86 : vector<2x32xf32>
    %95 = arith.addf %93, %94 : vector<2x32xf32>
    %96 = math.tanh %95 : vector<2x32xf32>
    %97 = arith.mulf %92, %96 : vector<2x32xf32>
    %c3 = arith.constant 3 : index
    %c0_31 = arith.constant 0 : index
    %98 = tpu.strided_load %arg12[%c3, %c0_31] {strides = array<i32: 8, 1>} : memref<16x128xf32, #tpu.memory_space<vmem>>, vector<2x128xf32>
    %cst_32 = arith.constant dense<0.000000e+00> : vector<2x128xf32>
    %99 = tpu.matmul %97, %11, %cst_32 {dimension_numbers = #tpu.dot_dimension_numbers<[1], [0], [0], [1], [0, 0, 1, 1], [], []>} : vector<2x32xf32>, vector<32x128xf32>, vector<2x128xf32> -> vector<2x128xf32>
    %100 = arith.addf %98, %99 : vector<2x128xf32>
    %101 = vector.extract_strided_slice %100 {offsets = [0, 0], sizes = [2, 32], strides = [1, 1]} : vector<2x128xf32> to vector<2x32xf32>
    %102 = arith.negf %101 : vector<2x32xf32>
    %103 = math.exp %102 : vector<2x32xf32>
    %cst_33 = arith.constant 1.000000e+00 : f32
    %104 = vector.broadcast %cst_33 : f32 to vector<2x32xf32>
    %105 = arith.addf %104, %103 : vector<2x32xf32>
    %106 = arith.divf %104, %105 : vector<2x32xf32>
    %107 = vector.extract_strided_slice %100 {offsets = [0, 32], sizes = [2, 32], strides = [1, 1]} : vector<2x128xf32> to vector<2x32xf32>
    %108 = arith.negf %107 : vector<2x32xf32>
    %109 = math.exp %108 : vector<2x32xf32>
    %cst_34 = arith.constant 1.000000e+00 : f32
    %110 = vector.broadcast %cst_34 : f32 to vector<2x32xf32>
    %111 = arith.addf %110, %109 : vector<2x32xf32>
    %112 = arith.divf %110, %111 : vector<2x32xf32>
    %113 = vector.extract_strided_slice %100 {offsets = [0, 64], sizes = [2, 32], strides = [1, 1]} : vector<2x128xf32> to vector<2x32xf32>
    %114 = math.tanh %113 : vector<2x32xf32>
    %115 = vector.extract_strided_slice %100 {offsets = [0, 96], sizes = [2, 32], strides = [1, 1]} : vector<2x128xf32> to vector<2x32xf32>
    %116 = arith.negf %115 : vector<2x32xf32>
    %117 = math.exp %116 : vector<2x32xf32>
    %cst_35 = arith.constant 1.000000e+00 : f32
    %118 = vector.broadcast %cst_35 : f32 to vector<2x32xf32>
    %119 = arith.addf %118, %117 : vector<2x32xf32>
    %120 = arith.divf %118, %119 : vector<2x32xf32>
    %121 = arith.mulf %112, %95 : vector<2x32xf32>
    %122 = arith.mulf %106, %114 : vector<2x32xf32>
    %123 = arith.addf %121, %122 : vector<2x32xf32>
    %124 = math.tanh %123 : vector<2x32xf32>
    %125 = arith.mulf %120, %124 : vector<2x32xf32>
    %c4 = arith.constant 4 : index
    %c0_36 = arith.constant 0 : index
    %126 = tpu.strided_load %arg12[%c4, %c0_36] {strides = array<i32: 8, 1>} : memref<16x128xf32, #tpu.memory_space<vmem>>, vector<2x128xf32>
    %cst_37 = arith.constant dense<0.000000e+00> : vector<2x128xf32>
    %127 = tpu.matmul %125, %11, %cst_37 {dimension_numbers = #tpu.dot_dimension_numbers<[1], [0], [0], [1], [0, 0, 1, 1], [], []>} : vector<2x32xf32>, vector<32x128xf32>, vector<2x128xf32> -> vector<2x128xf32>
    %128 = arith.addf %126, %127 : vector<2x128xf32>
    %129 = vector.extract_strided_slice %128 {offsets = [0, 0], sizes = [2, 32], strides = [1, 1]} : vector<2x128xf32> to vector<2x32xf32>
    %130 = arith.negf %129 : vector<2x32xf32>
    %131 = math.exp %130 : vector<2x32xf32>
    %cst_38 = arith.constant 1.000000e+00 : f32
    %132 = vector.broadcast %cst_38 : f32 to vector<2x32xf32>
    %133 = arith.addf %132, %131 : vector<2x32xf32>
    %134 = arith.divf %132, %133 : vector<2x32xf32>
    %135 = vector.extract_strided_slice %128 {offsets = [0, 32], sizes = [2, 32], strides = [1, 1]} : vector<2x128xf32> to vector<2x32xf32>
    %136 = arith.negf %135 : vector<2x32xf32>
    %137 = math.exp %136 : vector<2x32xf32>
    %cst_39 = arith.constant 1.000000e+00 : f32
    %138 = vector.broadcast %cst_39 : f32 to vector<2x32xf32>
    %139 = arith.addf %138, %137 : vector<2x32xf32>
    %140 = arith.divf %138, %139 : vector<2x32xf32>
    %141 = vector.extract_strided_slice %128 {offsets = [0, 64], sizes = [2, 32], strides = [1, 1]} : vector<2x128xf32> to vector<2x32xf32>
    %142 = math.tanh %141 : vector<2x32xf32>
    %143 = vector.extract_strided_slice %128 {offsets = [0, 96], sizes = [2, 32], strides = [1, 1]} : vector<2x128xf32> to vector<2x32xf32>
    %144 = arith.negf %143 : vector<2x32xf32>
    %145 = math.exp %144 : vector<2x32xf32>
    %cst_40 = arith.constant 1.000000e+00 : f32
    %146 = vector.broadcast %cst_40 : f32 to vector<2x32xf32>
    %147 = arith.addf %146, %145 : vector<2x32xf32>
    %148 = arith.divf %146, %147 : vector<2x32xf32>
    %149 = arith.mulf %140, %123 : vector<2x32xf32>
    %150 = arith.mulf %134, %142 : vector<2x32xf32>
    %151 = arith.addf %149, %150 : vector<2x32xf32>
    %152 = math.tanh %151 : vector<2x32xf32>
    %153 = arith.mulf %148, %152 : vector<2x32xf32>
    %c5 = arith.constant 5 : index
    %c0_41 = arith.constant 0 : index
    %154 = tpu.strided_load %arg12[%c5, %c0_41] {strides = array<i32: 8, 1>} : memref<16x128xf32, #tpu.memory_space<vmem>>, vector<2x128xf32>
    %cst_42 = arith.constant dense<0.000000e+00> : vector<2x128xf32>
    %155 = tpu.matmul %153, %11, %cst_42 {dimension_numbers = #tpu.dot_dimension_numbers<[1], [0], [0], [1], [0, 0, 1, 1], [], []>} : vector<2x32xf32>, vector<32x128xf32>, vector<2x128xf32> -> vector<2x128xf32>
    %156 = arith.addf %154, %155 : vector<2x128xf32>
    %157 = vector.extract_strided_slice %156 {offsets = [0, 0], sizes = [2, 32], strides = [1, 1]} : vector<2x128xf32> to vector<2x32xf32>
    %158 = arith.negf %157 : vector<2x32xf32>
    %159 = math.exp %158 : vector<2x32xf32>
    %cst_43 = arith.constant 1.000000e+00 : f32
    %160 = vector.broadcast %cst_43 : f32 to vector<2x32xf32>
    %161 = arith.addf %160, %159 : vector<2x32xf32>
    %162 = arith.divf %160, %161 : vector<2x32xf32>
    %163 = vector.extract_strided_slice %156 {offsets = [0, 32], sizes = [2, 32], strides = [1, 1]} : vector<2x128xf32> to vector<2x32xf32>
    %164 = arith.negf %163 : vector<2x32xf32>
    %165 = math.exp %164 : vector<2x32xf32>
    %cst_44 = arith.constant 1.000000e+00 : f32
    %166 = vector.broadcast %cst_44 : f32 to vector<2x32xf32>
    %167 = arith.addf %166, %165 : vector<2x32xf32>
    %168 = arith.divf %166, %167 : vector<2x32xf32>
    %169 = vector.extract_strided_slice %156 {offsets = [0, 64], sizes = [2, 32], strides = [1, 1]} : vector<2x128xf32> to vector<2x32xf32>
    %170 = math.tanh %169 : vector<2x32xf32>
    %171 = vector.extract_strided_slice %156 {offsets = [0, 96], sizes = [2, 32], strides = [1, 1]} : vector<2x128xf32> to vector<2x32xf32>
    %172 = arith.negf %171 : vector<2x32xf32>
    %173 = math.exp %172 : vector<2x32xf32>
    %cst_45 = arith.constant 1.000000e+00 : f32
    %174 = vector.broadcast %cst_45 : f32 to vector<2x32xf32>
    %175 = arith.addf %174, %173 : vector<2x32xf32>
    %176 = arith.divf %174, %175 : vector<2x32xf32>
    %177 = arith.mulf %168, %151 : vector<2x32xf32>
    %178 = arith.mulf %162, %170 : vector<2x32xf32>
    %179 = arith.addf %177, %178 : vector<2x32xf32>
    %180 = math.tanh %179 : vector<2x32xf32>
    %181 = arith.mulf %176, %180 : vector<2x32xf32>
    %c6 = arith.constant 6 : index
    %c0_46 = arith.constant 0 : index
    %182 = tpu.strided_load %arg12[%c6, %c0_46] {strides = array<i32: 8, 1>} : memref<16x128xf32, #tpu.memory_space<vmem>>, vector<2x128xf32>
    %cst_47 = arith.constant dense<0.000000e+00> : vector<2x128xf32>
    %183 = tpu.matmul %181, %11, %cst_47 {dimension_numbers = #tpu.dot_dimension_numbers<[1], [0], [0], [1], [0, 0, 1, 1], [], []>} : vector<2x32xf32>, vector<32x128xf32>, vector<2x128xf32> -> vector<2x128xf32>
    %184 = arith.addf %182, %183 : vector<2x128xf32>
    %185 = vector.extract_strided_slice %184 {offsets = [0, 0], sizes = [2, 32], strides = [1, 1]} : vector<2x128xf32> to vector<2x32xf32>
    %186 = arith.negf %185 : vector<2x32xf32>
    %187 = math.exp %186 : vector<2x32xf32>
    %cst_48 = arith.constant 1.000000e+00 : f32
    %188 = vector.broadcast %cst_48 : f32 to vector<2x32xf32>
    %189 = arith.addf %188, %187 : vector<2x32xf32>
    %190 = arith.divf %188, %189 : vector<2x32xf32>
    %191 = vector.extract_strided_slice %184 {offsets = [0, 32], sizes = [2, 32], strides = [1, 1]} : vector<2x128xf32> to vector<2x32xf32>
    %192 = arith.negf %191 : vector<2x32xf32>
    %193 = math.exp %192 : vector<2x32xf32>
    %cst_49 = arith.constant 1.000000e+00 : f32
    %194 = vector.broadcast %cst_49 : f32 to vector<2x32xf32>
    %195 = arith.addf %194, %193 : vector<2x32xf32>
    %196 = arith.divf %194, %195 : vector<2x32xf32>
    %197 = vector.extract_strided_slice %184 {offsets = [0, 64], sizes = [2, 32], strides = [1, 1]} : vector<2x128xf32> to vector<2x32xf32>
    %198 = math.tanh %197 : vector<2x32xf32>
    %199 = vector.extract_strided_slice %184 {offsets = [0, 96], sizes = [2, 32], strides = [1, 1]} : vector<2x128xf32> to vector<2x32xf32>
    %200 = arith.negf %199 : vector<2x32xf32>
    %201 = math.exp %200 : vector<2x32xf32>
    %cst_50 = arith.constant 1.000000e+00 : f32
    %202 = vector.broadcast %cst_50 : f32 to vector<2x32xf32>
    %203 = arith.addf %202, %201 : vector<2x32xf32>
    %204 = arith.divf %202, %203 : vector<2x32xf32>
    %205 = arith.mulf %196, %179 : vector<2x32xf32>
    %206 = arith.mulf %190, %198 : vector<2x32xf32>
    %207 = arith.addf %205, %206 : vector<2x32xf32>
    %208 = math.tanh %207 : vector<2x32xf32>
    %209 = arith.mulf %204, %208 : vector<2x32xf32>
    %c7 = arith.constant 7 : index
    %c0_51 = arith.constant 0 : index
    %210 = tpu.strided_load %arg12[%c7, %c0_51] {strides = array<i32: 8, 1>} : memref<16x128xf32, #tpu.memory_space<vmem>>, vector<2x128xf32>
    %cst_52 = arith.constant dense<0.000000e+00> : vector<2x128xf32>
    %211 = tpu.matmul %209, %11, %cst_52 {dimension_numbers = #tpu.dot_dimension_numbers<[1], [0], [0], [1], [0, 0, 1, 1], [], []>} : vector<2x32xf32>, vector<32x128xf32>, vector<2x128xf32> -> vector<2x128xf32>
    %212 = arith.addf %210, %211 : vector<2x128xf32>
    %213 = vector.extract_strided_slice %212 {offsets = [0, 0], sizes = [2, 32], strides = [1, 1]} : vector<2x128xf32> to vector<2x32xf32>
    %214 = arith.negf %213 : vector<2x32xf32>
    %215 = math.exp %214 : vector<2x32xf32>
    %cst_53 = arith.constant 1.000000e+00 : f32
    %216 = vector.broadcast %cst_53 : f32 to vector<2x32xf32>
    %217 = arith.addf %216, %215 : vector<2x32xf32>
    %218 = arith.divf %216, %217 : vector<2x32xf32>
    %219 = vector.extract_strided_slice %212 {offsets = [0, 32], sizes = [2, 32], strides = [1, 1]} : vector<2x128xf32> to vector<2x32xf32>
    %220 = arith.negf %219 : vector<2x32xf32>
    %221 = math.exp %220 : vector<2x32xf32>
    %cst_54 = arith.constant 1.000000e+00 : f32
    %222 = vector.broadcast %cst_54 : f32 to vector<2x32xf32>
    %223 = arith.addf %222, %221 : vector<2x32xf32>
    %224 = arith.divf %222, %223 : vector<2x32xf32>
    %225 = vector.extract_strided_slice %212 {offsets = [0, 64], sizes = [2, 32], strides = [1, 1]} : vector<2x128xf32> to vector<2x32xf32>
    %226 = math.tanh %225 : vector<2x32xf32>
    %227 = vector.extract_strided_slice %212 {offsets = [0, 96], sizes = [2, 32], strides = [1, 1]} : vector<2x128xf32> to vector<2x32xf32>
    %228 = arith.negf %227 : vector<2x32xf32>
    %229 = math.exp %228 : vector<2x32xf32>
    %cst_55 = arith.constant 1.000000e+00 : f32
    %230 = vector.broadcast %cst_55 : f32 to vector<2x32xf32>
    %231 = arith.addf %230, %229 : vector<2x32xf32>
    %232 = arith.divf %230, %231 : vector<2x32xf32>
    %233 = arith.mulf %224, %207 : vector<2x32xf32>
    %234 = arith.mulf %218, %226 : vector<2x32xf32>
    %235 = arith.addf %233, %234 : vector<2x32xf32>
    %236 = math.tanh %235 : vector<2x32xf32>
    %237 = arith.mulf %232, %236 : vector<2x32xf32>
    %c0_56 = arith.constant 0 : index
    %c0_57 = arith.constant 0 : index
    %238 = vector.load %arg10[%c0_56, %c0_57] : memref<2x32xf32, #tpu.memory_space<vmem>>, vector<2x32xf32>
    tpu.vector_store %arg10[%c0_56, %c0_57], %237 {strides = array<i32>} : memref<2x32xf32, #tpu.memory_space<vmem>>, vector<2x32xf32>,
    %c0_58 = arith.constant 0 : index
    %c0_59 = arith.constant 0 : index
    %239 = vector.load %arg11[%c0_58, %c0_59] : memref<2x32xf32, #tpu.memory_space<vmem>>, vector<2x32xf32>
    tpu.vector_store %arg11[%c0_58, %c0_59], %235 {strides = array<i32>} : memref<2x32xf32, #tpu.memory_space<vmem>>, vector<2x32xf32>,
    %c0_i32_60 = arith.constant 0 : i32
    %240 = arith.cmpi eq, %arg0, %c0_i32_60 : i32
    %241 = arith.extui %240 : i1 to i32
    %c0_i32_61 = arith.constant 0 : i32
    %242 = arith.cmpi ne, %241, %c0_i32_61 : i32
    scf.if %242 {
      %cst_62 = arith.constant 0.000000e+00 : f32
      %243 = vector.broadcast %cst_62 : f32 to vector<2x32xf32>
      %244 = arith.maximumf %237, %243 : vector<2x32xf32>
      %c0_63 = arith.constant 0 : index
      %c0_64 = arith.constant 0 : index
      %245 = vector.load %arg5[%c0_63, %c0_64] : memref<32x16xf32, #tpu.memory_space<vmem>>, vector<32x16xf32>
      %cst_65 = arith.constant dense<0.000000e+00> : vector<2x16xf32>
      %246 = tpu.matmul %244, %245, %cst_65 {dimension_numbers = #tpu.dot_dimension_numbers<[1], [0], [0], [1], [0, 0, 1, 1], [], []>} : vector<2x32xf32>, vector<32x16xf32>, vector<2x16xf32> -> vector<2x16xf32>
      %c0_66 = arith.constant 0 : index
      %c0_67 = arith.constant 0 : index
      %247 = vector.load %arg6[%c0_66, %c0_67] : memref<1x16xf32, #tpu.memory_space<vmem>>, vector<1x16xf32>
      %248 = vector.broadcast %247 : vector<1x16xf32> to vector<2x16xf32>
      %249 = arith.addf %246, %248 : vector<2x16xf32>
      %cst_68 = arith.constant 0.000000e+00 : f32
      %250 = vector.broadcast %cst_68 : f32 to vector<2x16xf32>
      %251 = arith.maximumf %249, %250 : vector<2x16xf32>
      %c0_69 = arith.constant 0 : index
      %c0_70 = arith.constant 0 : index
      %252 = vector.load %arg7[%c0_69, %c0_70] : memref<1x16xf32, #tpu.memory_space<vmem>>, vector<1x16xf32>
      %253 = vector.broadcast %252 : vector<1x16xf32> to vector<2x16xf32>
      %254 = arith.mulf %251, %253 : vector<2x16xf32>
      %cst_71 = arith.constant dense<0.000000e+00> : vector<2xf32>
      %255 = vector.multi_reduction <add>, %254, %cst_71 [1] : vector<2x16xf32> to vector<2xf32>
      %256 = vector.shape_cast %255 : vector<2xf32> to vector<2x1xf32>
      %c0_72 = arith.constant 0 : index
      %c0_73 = arith.constant 0 : index
      %257 = vector.load %arg8[%c0_72, %c0_73] : memref<1x1xf32, #tpu.memory_space<vmem>>, vector<1x1xf32>
      %258 = vector.broadcast %257 : vector<1x1xf32> to vector<2x1xf32>
      %259 = arith.addf %256, %258 : vector<2x1xf32>
      %260 = arith.negf %259 : vector<2x1xf32>
      %261 = math.exp %260 : vector<2x1xf32>
      %cst_74 = arith.constant 1.000000e+00 : f32
      %262 = vector.broadcast %cst_74 : f32 to vector<2x1xf32>
      %263 = arith.addf %262, %261 : vector<2x1xf32>
      %264 = arith.divf %262, %263 : vector<2x1xf32>
      %c0_75 = arith.constant 0 : index
      %c0_76 = arith.constant 0 : index
      %265 = vector.load %arg9[%c0_75, %c0_76] : memref<2x1xf32, #tpu.memory_space<vmem>>, vector<2x1xf32>
      tpu.vector_store %arg9[%c0_75, %c0_76], %264 {strides = array<i32>} : memref<2x1xf32, #tpu.memory_space<vmem>>, vector<2x1xf32>,
    } else {
    }
    return
  }
  func.func @transform_0(%arg0: i32) -> (i32, i32, i32) {
    %c0_i32 = arith.constant 0 : i32
    %c0_i32_0 = arith.constant 0 : i32
    %c0_i32_1 = arith.constant 0 : i32
    return %c0_i32, %arg0, %c0_i32_0 : i32, i32, i32
  }
  func.func @transform_1(%arg0: i32) -> (i32, i32) {
    %c0_i32 = arith.constant 0 : i32
    %c0_i32_0 = arith.constant 0 : i32
    %c0_i32_1 = arith.constant 0 : i32
    return %c0_i32, %c0_i32_0 : i32, i32
  }
  func.func @transform_2(%arg0: i32) -> (i32, i32) {
    %c0_i32 = arith.constant 0 : i32
    %c0_i32_0 = arith.constant 0 : i32
    %c0_i32_1 = arith.constant 0 : i32
    return %c0_i32, %c0_i32_0 : i32, i32
  }
  func.func @transform_3(%arg0: i32) -> (i32, i32) {
    %c0_i32 = arith.constant 0 : i32
    %c0_i32_0 = arith.constant 0 : i32
    %c0_i32_1 = arith.constant 0 : i32
    return %c0_i32, %c0_i32_0 : i32, i32
  }
  func.func @transform_4(%arg0: i32) -> (i32, i32) {
    %c0_i32 = arith.constant 0 : i32
    %c0_i32_0 = arith.constant 0 : i32
    %c0_i32_1 = arith.constant 0 : i32
    return %c0_i32, %c0_i32_0 : i32, i32
  }
  func.func @transform_5(%arg0: i32) -> (i32, i32) {
    %c0_i32 = arith.constant 0 : i32
    %c0_i32_0 = arith.constant 0 : i32
    %c0_i32_1 = arith.constant 0 : i32
    return %c0_i32, %c0_i32_0 : i32, i32
  }
  func.func @transform_6(%arg0: i32) -> (i32, i32) {
    %c0_i32 = arith.constant 0 : i32
    %c0_i32_0 = arith.constant 0 : i32
    %c0_i32_1 = arith.constant 0 : i32
    return %c0_i32, %c0_i32_0 : i32, i32
  }
  func.func @transform_7(%arg0: i32) -> (i32, i32) {
    %c0_i32 = arith.constant 0 : i32
    %c0_i32_0 = arith.constant 0 : i32
    %c0_i32_1 = arith.constant 0 : i32
    return %c0_i32, %c0_i32_0 : i32, i32
  }
  func.func @transform_8(%arg0: i32) -> (i32, i32) {
    %c0_i32 = arith.constant 0 : i32
    %c0_i32_0 = arith.constant 0 : i32
    %c0_i32_1 = arith.constant 0 : i32
    return %c0_i32, %c0_i32_0 : i32, i32
  }
}

</mosaic_0001>

<bundles_post_ra>
// kernel: lstm_reload_net.1
= control target key start
LH: loop header
LB: loop body
LE: loop exit
PB: predicated region body
PF: predicated region fallthrough
CT: control target
= control target key end

     0   :  { %s1025_s0 = inlined_call_operand.vmem [shape: f32[2,8,16], index: 0, kind: input, shape index: {}]   ;;  %s1026_s1 = inlined_call_operand.vmem [shape: f32[16,128], index: 1, kind: input, shape index: {}]   ;;  %s1027_s2 = inlined_call_operand.vmem [shape: f32[32,128], index: 2, kind: input, shape index: {}]   ;;  %s1028_s3 = inlined_call_operand.vmem [shape: f32[1,128], index: 3, kind: input, shape index: {}]   ;;  %s1029_s4 = inlined_call_operand.vmem [shape: f32[32,16], index: 4, kind: input, shape index: {}]   ;;  %s1030_s5 = inlined_call_operand.hbm [shape: f32[1,16], index: 5, kind: input, shape index: {}]   ;;  %s1031_s6 = inlined_call_operand.hbm [shape: f32[1,16], index: 6, kind: input, shape index: {}]   ;;  %s1032_s7 = inlined_call_operand.<no memory space> [shape: f32[1,1], index: 7, kind: input, shape index: {}]   ;;  %s1033_s8 = inlined_call_operand.vmem [shape: f32[2,1], index: 8, kind: output, shape index: {}]  }
   0x1   :  { %v13_v0 = vstv %s1032_s7 }
   0x2   :  { %14 = vst [vmem:[#allocation5] sm:$0x1] %v13_v0 }
   0x3   :  { %15 = vsyncpa [#allocation7], 0  ;;  %s32_s9 = sshll.u32 %s1030_s5, 4  ;;  %s33_s9 = int_to_ptr.hbm [resolvable:$true] %s32_s9 }
   0x4   :  { %16 = vsyncpa [#allocation9], 0  ;;  %s874_s10 = smov [#allocation6]   ;;  %s43_s14 = sshll.u32 %s1031_s6, 4  ;;  %s44_s14 = int_to_ptr.hbm [resolvable:$true] %s43_s14 }
   0x5   :  { %s34_s11 = sshll.u32 %s874_s10, 4  ;;  %s875_s15 = smov [#allocation8]   ;;  %s35_s11 = int_to_ptr.vmem [resolvable:$true] %s34_s11 }
   0x6   :  { %37 = dma.hbm_to_vmem [thread:$0]  %s33_s9, 16, %s35_s11, [#allocation7]  }
   0x7   :  { %s45_s16 = sshll.u32 %s875_s15, 4  ;;  %s46_s16 = int_to_ptr.vmem [resolvable:$true] %s45_s16 }
   0x8   :  { %48 = dma.hbm_to_vmem [thread:$0]  %s44_s14, 16, %s46_s16, [#allocation9]  }
   0x9   :  { %870 = dma.done.wait [#allocation7], 16  }
   0xa   :  { %871 = vsyncadd [#allocation7], 4294967280 }
   0xb   :  { %872 = dma.done.wait [#allocation9], 16  }
   0xc   :  { %873 = vsyncadd [#allocation9], 4294967280  ;;  %vm63_vm0 = vcmask 254976   ;;  %v876_v1 = vmov 0.0   ;;  %v69_v2 = vld [vmem:[%s1026_s1 + $0x8] sm:$0xff]  ;;  %v68_v3 = vld [vmem:[%s1026_s1] sm:$0xff] }
   0xd   :  { %64 = vst.msk [vmem:[#allocation2] sm:$0x3] %vm63_vm0, %v876_v1  ;;  %95 = vmatpush.msra.mxu0 %v69_v2  ;;  %v66_v4 = vld [vmem:[%s1025_s0] sm:$0xff]  ;;  %vm74_vm1 = vcmask 130048   ;;  %v109_v5 = vld [vmem:[%s1027_s2 + $0x18] sm:$0xff]  ;;  %v108_v6 = vld [vmem:[%s1027_s2 + $0x10] sm:$0xff] }
   0xe   :  { %65 = vst.msk [vmem:[#allocation3] sm:$0x3] %vm63_vm0, %v876_v1  ;;  %129 = vmatpush.msra.mxu1 %v109_v5  ;;  %198 = vmatpush.msra.mxu2 %v109_v5  ;;  %v107_v7 = vld [vmem:[%s1027_s2 + $0x8] sm:$0xff]  ;;  %v106_v8 = vld [vmem:[%s1027_s2] sm:$0xff]  ;;  %vm113_vm2 = vcmask 261120   ;;  %s877_s29 = smov 64  }
   0xf   :  { %96 = vmatpush.msra.mxu0 %v68_v3  ;;  %263 = vmatpush.msra.mxu3 %v109_v5  ;;  %v67_v10 = vld [vmem:[%s1025_s0 + $0x8] sm:$0xff]  ;;  %v750_v11 = vld [vmem:[%s1028_s3] ss:$0 sm:$0xff]  ;;  %s878_s30 = smov 32   ;;  %s879_s16 = smov 96  }
  0x10   :  { %724 = vmatmul.msk.f32.vlgmr.msra.gmra.mxu0 %vm74_vm1, %v66_v4  ;;  %130 = vmatpush.msra.mxu1 %v108_v6 }
  0x11   :  { %199 = vmatpush.msra.mxu2 %v108_v6  ;;  %264 = vmatpush.msra.mxu3 %v108_v6 }
  0x12   :  { %131 = vmatpush.msra.mxu1 %v107_v7  ;;  %523 = vmatpush.msrb.mxu0 %v109_v5 }
  0x13   :  { %200 = vmatpush.msra.mxu2 %v107_v7  ;;  %265 = vmatpush.msra.mxu3 %v107_v7 }
  0x14   :  { %v110_v9 = vld [vmem:[#allocation2] sm:$0x3]  ;;  %132 = vmatpush.msra.mxu1 %v106_v8  ;;  %524 = vmatpush.msrb.mxu0 %v108_v6 }
  0x15   :  { %726 = vmatmul.msk.f32.vlgmr.msra.gmra.mxu1 %vm113_vm2, %v110_v9  ;;  %201 = vmatpush.msra.mxu2 %v106_v8  ;;  %v111_v20 = vld [vmem:[#allocation3] sm:$0x3] }
  0x16   :  { %266 = vmatpush.msra.mxu3 %v106_v8  ;;  %328 = vmatpush.msrb.mxu1 %v109_v5 }
  0x17   :  { %393 = vmatpush.msrb.mxu2 %v109_v5  ;;  %525 = vmatpush.msrb.mxu0 %v107_v7 }
  0x18   :  { %458 = vmatpush.msrb.mxu3 %v109_v5  ;;  %725 = vmatmul.msk.f32.gmra.mxu0 %vm74_vm1, %v67_v10 }
  0x19   :  { %329 = vmatpush.msrb.mxu1 %v108_v6  ;;  %394 = vmatpush.msrb.mxu2 %v108_v6 }
  0x1a   :  { %459 = vmatpush.msrb.mxu3 %v108_v6  ;;  %526 = vmatpush.msrb.mxu0 %v106_v8 }
  0x1b   :  { %330 = vmatpush.msrb.mxu1 %v107_v7  ;;  %395 = vmatpush.msrb.mxu2 %v107_v7 }
  0x1c   :  { %460 = vmatpush.msrb.mxu3 %v107_v7 }
  0x1d   :  { %331 = vmatpush.msrb.mxu1 %v106_v8  ;;  %396 = vmatpush.msrb.mxu2 %v106_v8 }
  0x1e   :  { %461 = vmatpush.msrb.mxu3 %v106_v8 }
  0x1f   :  { %588 = vmatpush.msra.mxu1 %v109_v5 }
  0x21   :  { %589 = vmatpush.msra.mxu1 %v108_v6 }
  0x23   :  { %590 = vmatpush.msra.mxu1 %v107_v7 }
  0x25   :  { %591 = vmatpush.msra.mxu1 %v106_v8 }
  0x8d   :  { %v98_v12 = vpop.f32.mrf.mxu0 }
  0x8e   :  { %v99_v13 = vadd.f32 %v750_v11, %v98_v12 }
  0x90   :  { %104 = vst [vmem:[#allocation4] sm:$0xff] %v99_v13 }
  0x92   :  { %v134_v16 = vpop.f32.mrf.mxu1 }
  0x95   :  { %v101_v14 = vpop.f32.mrf.mxu0 }
  0x96   :  { %v102_v15 = vadd.f32 %v750_v11, %v101_v14 }
  0x98   :  { %105 = vst [vmem:[#allocation4 + $0x8] sm:$0xff] %v102_v15 }
  0x9f   :  { %v112_v17 = vld [vmem:[#allocation4] ss:$8 sm:$0x3]  ;;  %v180_v44 = vld [vmem:[#allocation4 + $0x1] ss:$8 sm:$0x3] }
  0xa0   :  { %v137_v18 = vadd.f32 %v134_v16, %v112_v17  ;;  %v245_v6 = vld [vmem:[#allocation4 + $0x2] ss:$8 sm:$0x3] }
  0xa2   :  { %754 = vtanh.f32 %v137_v18  ;;  %v727_v21 = vmul.f32 -1.442695, %v137_v18 }
  0xa4   :  { %756 = vpow2.f32 %v727_v21 }
  0xa8   :  { %v755_v19 = vpop.eup %754 }
  0xa9   :  { %164 = vrot.lane.b32.xlu0 %v755_v19, %s877_s29 }
  0xaa   :  { %v757_v22 = vpop.eup %756 }
  0xab   :  { %v141_v23 = vadd.f32 1.0, %v757_v22 }
  0xad   :  { %758 = vrcp.f32 %v141_v23  ;;  %v153_v29 = vand.u32 2147483648, %v141_v23  ;;  %vm147_vm4 = vweird.f32 %v141_v23  ;;  %v151_v30 = vand.u32 2147483647, %v141_v23 }
  0xaf   :  { %v154_v32 = vor.u32 1.1754944e-38, %v153_v29  ;;  %vm152_vm6 = vcmp.eq.f32.partialorder %v151_v30, 8.507059e+37 }
  0xb1   :  { %159 = vrot.lane.b32.xlu0 %v111_v20, %s878_s30 }
  0xb3   :  { %v759_v24 = vpop.eup %758 }
  0xb4   :  { %v143_v25 = vmul.f32 %v759_v24, %v141_v23  ;;  %vm148_vm3 = vweird.f32 %v759_v24 }
  0xb5   :  { %vm149_vm5 = vmor %vm147_vm4, %vm148_vm3 }
  0xb6   :  { %v144_v26 = vsub.f32 1.0, %v143_v25 }
  0xb8   :  { %v145_v27 = vmul.f32 %v759_v24, %v144_v26 }
  0xba   :  { %v146_v28 = vadd.f32 %v759_v24, %v145_v27 }
  0xbc   :  { %v150_v31 = vsel %vm149_vm5, %v759_v24, %v146_v28 }
  0xbd   :  { %v155_v34 = vsel %vm152_vm6, %v154_v32, %v150_v31  ;;  %v310_v32 = vld [vmem:[#allocation4 + $0x3] ss:$8 sm:$0x3] }
 0x11b   :  { %v165_v33 = vpop.permute.xlu0 %164 }
 0x11c   :  { %v167_v35 = vmul.f32 %v165_v33, %v155_v34 }
 0x11e   :  { %169 = vrot.lane.b32.xlu1 %v167_v35, %s878_s30 }
 0x123   :  { %v160_v36 = vpop.permute.xlu0 %159 }
 0x124   :  { %v162_v37 = vmul.f32 %v160_v36, %v155_v34 }
 0x190   :  { %v170_v38 = vpop.permute.xlu1 %169 }
 0x191   :  { %v172_v39 = vadd.f32 %v170_v38, %v162_v37 }
 0x193   :  { %760 = vtanh.f32 %v172_v39 }
 0x199   :  { %v761_v40 = vpop.eup %760 }
 0x19a   :  { %175 = vrot.lane.b32.xlu1 %v761_v40, %s877_s29 }
 0x20c   :  { %v176_v41 = vpop.permute.xlu1 %175 }
 0x20d   :  { %v178_v42 = vmul.f32 %v176_v41, %v155_v34 }
 0x20f   :  { %182 = vrot.lane.b32.xlu2 %v178_v42, %s878_s30 }
 0x269   :  { %v183_v43 = vpop.permute.xlu2 %182 }
 0x26a   :  { %728 = vmatmul.msk.f32.vlgmr.msra.gmra.mxu2 %vm113_vm2, %v183_v43 }
 0x2ed   :  { %v203_v45 = vpop.f32.mrf.mxu2 }
 0x2ee   :  { %v206_v46 = vadd.f32 %v203_v45, %v180_v44 }
 0x2f0   :  { %762 = vtanh.f32 %v206_v46  ;;  %v729_v48 = vmul.f32 -1.442695, %v206_v46 }
 0x2f2   :  { %764 = vpow2.f32 %v729_v48 }
 0x2f6   :  { %v763_v47 = vpop.eup %762 }
 0x2f7   :  { %229 = vrot.lane.b32.xlu2 %v763_v47, %s877_s29 }
 0x2f8   :  { %v765_v49 = vpop.eup %764 }
 0x2f9   :  { %v210_v50 = vadd.f32 1.0, %v765_v49 }
 0x2fb   :  { %766 = vrcp.f32 %v210_v50  ;;  %v222_v56 = vand.u32 2147483648, %v210_v50  ;;  %vm216_vm8 = vweird.f32 %v210_v50  ;;  %v220_v57 = vand.u32 2147483647, %v210_v50 }
 0x2fd   :  { %v223_v59 = vor.u32 1.1754944e-38, %v222_v56  ;;  %vm221_vm10 = vcmp.eq.f32.partialorder %v220_v57, 8.507059e+37 }
 0x301   :  { %v767_v51 = vpop.eup %766 }
 0x302   :  { %v212_v52 = vmul.f32 %v767_v51, %v210_v50  ;;  %vm217_vm7 = vweird.f32 %v767_v51 }
 0x303   :  { %vm218_vm9 = vmor %vm216_vm8, %vm217_vm7 }
 0x304   :  { %v213_v53 = vsub.f32 1.0, %v212_v52 }
 0x306   :  { %v214_v54 = vmul.f32 %v767_v51, %v213_v53 }
 0x308   :  { %v215_v55 = vadd.f32 %v767_v51, %v214_v54 }
 0x30a   :  { %v219_v58 = vsel %vm218_vm9, %v767_v51, %v215_v55 }
 0x30b   :  { %v224_v61 = vsel %vm221_vm10, %v223_v59, %v219_v58  ;;  %v375_v58 = vld [vmem:[#allocation4 + $0x4] ss:$8 sm:$0x3] }
 0x30c   :  { %v227_v63 = vmul.f32 %v224_v61, %v172_v39 }
 0x351   :  { %v230_v60 = vpop.permute.xlu2 %229 }
 0x352   :  { %v232_v62 = vmul.f32 %v230_v60, %v224_v61 }
 0x354   :  { %234 = vrot.lane.b32.xlu0 %v232_v62, %s878_s30 }
 0x3c6   :  { %v235_v0 = vpop.permute.xlu0 %234 }
 0x3c7   :  { %v237_v1 = vadd.f32 %v235_v0, %v227_v63 }
 0x3c9   :  { %768 = vtanh.f32 %v237_v1 }
 0x3cf   :  { %v769_v2 = vpop.eup %768 }
 0x3d0   :  { %240 = vrot.lane.b32.xlu1 %v769_v2, %s877_s29 }
 0x442   :  { %v241_v3 = vpop.permute.xlu1 %240 }
 0x443   :  { %v243_v4 = vmul.f32 %v241_v3, %v224_v61 }
 0x445   :  { %247 = vrot.lane.b32.xlu2 %v243_v4, %s878_s30 }
 0x49f   :  { %v248_v5 = vpop.permute.xlu2 %247 }
 0x4a0   :  { %730 = vmatmul.msk.f32.vlgmr.msra.gmra.mxu3 %vm113_vm2, %v248_v5 }
 0x523   :  { %v268_v7 = vpop.f32.mrf.mxu3 }
 0x524   :  { %v271_v8 = vadd.f32 %v268_v7, %v245_v6 }
 0x526   :  { %770 = vtanh.f32 %v271_v8  ;;  %v731_v10 = vmul.f32 -1.442695, %v271_v8 }
 0x528   :  { %772 = vpow2.f32 %v731_v10 }
 0x52c   :  { %v771_v9 = vpop.eup %770 }
 0x52d   :  { %294 = vrot.lane.b32.xlu0 %v771_v9, %s877_s29 }
 0x52e   :  { %v773_v11 = vpop.eup %772 }
 0x52f   :  { %v275_v12 = vadd.f32 1.0, %v773_v11 }
 0x531   :  { %774 = vrcp.f32 %v275_v12  ;;  %v287_v18 = vand.u32 2147483648, %v275_v12  ;;  %vm281_vm12 = vweird.f32 %v275_v12  ;;  %v285_v19 = vand.u32 2147483647, %v275_v12 }
 0x533   :  { %v288_v21 = vor.u32 1.1754944e-38, %v287_v18  ;;  %vm286_vm14 = vcmp.eq.f32.partialorder %v285_v19, 8.507059e+37 }
 0x537   :  { %v775_v13 = vpop.eup %774 }
 0x538   :  { %v277_v14 = vmul.f32 %v775_v13, %v275_v12  ;;  %vm282_vm11 = vweird.f32 %v775_v13 }
 0x539   :  { %vm283_vm13 = vmor %vm281_vm12, %vm282_vm11 }
 0x53a   :  { %v278_v15 = vsub.f32 1.0, %v277_v14 }
 0x53c   :  { %v279_v16 = vmul.f32 %v775_v13, %v278_v15 }
 0x53e   :  { %v280_v17 = vadd.f32 %v775_v13, %v279_v16 }
 0x540   :  { %v284_v20 = vsel %vm283_vm13, %v775_v13, %v280_v17 }
 0x541   :  { %v289_v23 = vsel %vm286_vm14, %v288_v21, %v284_v20  ;;  %v440_v20 = vld [vmem:[#allocation4 + $0x5] ss:$8 sm:$0x3] }
 0x542   :  { %v292_v25 = vmul.f32 %v289_v23, %v237_v1 }
 0x59f   :  { %v295_v22 = vpop.permute.xlu0 %294 }
 0x5a0   :  { %v297_v24 = vmul.f32 %v295_v22, %v289_v23 }
 0x5a2   :  { %299 = vrot.lane.b32.xlu1 %v297_v24, %s878_s30 }
 0x614   :  { %v300_v26 = vpop.permute.xlu1 %299 }
 0x615   :  { %v302_v27 = vadd.f32 %v300_v26, %v292_v25 }
 0x617   :  { %776 = vtanh.f32 %v302_v27 }
 0x61d   :  { %v777_v28 = vpop.eup %776 }
 0x61e   :  { %305 = vrot.lane.b32.xlu2 %v777_v28, %s877_s29 }
 0x678   :  { %v306_v29 = vpop.permute.xlu2 %305 }
 0x679   :  { %v308_v30 = vmul.f32 %v306_v29, %v289_v23 }
 0x67b   :  { %312 = vrot.lane.b32.xlu0 %v308_v30, %s878_s30 }
 0x6ed   :  { %v313_v31 = vpop.permute.xlu0 %312 }
 0x6ee   :  { %732 = vmatmul.msk.f32.vlgmr.msrb.gmra.mxu1 %vm113_vm2, %v313_v31 }
 0x76b   :  { %v333_v33 = vpop.f32.mrf.mxu1 }
 0x76c   :  { %v336_v34 = vadd.f32 %v333_v33, %v310_v32 }
 0x76e   :  { %778 = vtanh.f32 %v336_v34  ;;  %v733_v36 = vmul.f32 -1.442695, %v336_v34 }
 0x770   :  { %780 = vpow2.f32 %v733_v36 }
 0x774   :  { %v779_v35 = vpop.eup %778 }
 0x775   :  { %359 = vrot.lane.b32.xlu1 %v779_v35, %s877_s29 }
 0x776   :  { %v781_v37 = vpop.eup %780 }
 0x777   :  { %v340_v38 = vadd.f32 1.0, %v781_v37 }
 0x779   :  { %782 = vrcp.f32 %v340_v38  ;;  %v352_v44 = vand.u32 2147483648, %v340_v38  ;;  %vm346_vm1 = vweird.f32 %v340_v38  ;;  %v350_v45 = vand.u32 2147483647, %v340_v38 }
 0x77b   :  { %v353_v47 = vor.u32 1.1754944e-38, %v352_v44  ;;  %vm351_vm4 = vcmp.eq.f32.partialorder %v350_v45, 8.507059e+37 }
 0x77f   :  { %v783_v39 = vpop.eup %782 }
 0x780   :  { %v342_v40 = vmul.f32 %v783_v39, %v340_v38  ;;  %vm347_vm15 = vweird.f32 %v783_v39 }
 0x781   :  { %vm348_vm3 = vmor %vm346_vm1, %vm347_vm15 }
 0x782   :  { %v343_v41 = vsub.f32 1.0, %v342_v40 }
 0x784   :  { %v344_v42 = vmul.f32 %v783_v39, %v343_v41 }
 0x786   :  { %v345_v43 = vadd.f32 %v783_v39, %v344_v42 }
 0x788   :  { %v349_v46 = vsel %vm348_vm3, %v783_v39, %v345_v43 }
 0x789   :  { %v354_v49 = vsel %vm351_vm4, %v353_v47, %v349_v46  ;;  %v505_v46 = vld [vmem:[#allocation4 + $0x6] ss:$8 sm:$0x3] }
 0x78a   :  { %v357_v51 = vmul.f32 %v354_v49, %v302_v27 }
 0x7e7   :  { %v360_v48 = vpop.permute.xlu1 %359 }
 0x7e8   :  { %v362_v50 = vmul.f32 %v360_v48, %v354_v49 }
 0x7ea   :  { %364 = vrot.lane.b32.xlu2 %v362_v50, %s878_s30 }
 0x844   :  { %v365_v52 = vpop.permute.xlu2 %364 }
 0x845   :  { %v367_v53 = vadd.f32 %v365_v52, %v357_v51 }
 0x847   :  { %784 = vtanh.f32 %v367_v53 }
 0x84d   :  { %v785_v54 = vpop.eup %784 }
 0x84e   :  { %370 = vrot.lane.b32.xlu0 %v785_v54, %s877_s29 }
 0x8c0   :  { %v371_v55 = vpop.permute.xlu0 %370 }
 0x8c1   :  { %v373_v56 = vmul.f32 %v371_v55, %v354_v49 }
 0x8c3   :  { %377 = vrot.lane.b32.xlu1 %v373_v56, %s878_s30 }
 0x935   :  { %v378_v57 = vpop.permute.xlu1 %377 }
 0x936   :  { %734 = vmatmul.msk.f32.vlgmr.msrb.gmra.mxu2 %vm113_vm2, %v378_v57 }
 0x9b9   :  { %v398_v59 = vpop.f32.mrf.mxu2 }
 0x9ba   :  { %v401_v60 = vadd.f32 %v398_v59, %v375_v58 }
 0x9bc   :  { %786 = vtanh.f32 %v401_v60  ;;  %v735_v62 = vmul.f32 -1.442695, %v401_v60 }
 0x9be   :  { %788 = vpow2.f32 %v735_v62 }
 0x9c2   :  { %v787_v61 = vpop.eup %786 }
 0x9c3   :  { %424 = vrot.lane.b32.xlu2 %v787_v61, %s877_s29 }
 0x9c4   :  { %v789_v63 = vpop.eup %788 }
 0x9c5   :  { %v405_v0 = vadd.f32 1.0, %v789_v63 }
 0x9c7   :  { %790 = vrcp.f32 %v405_v0  ;;  %v417_v6 = vand.u32 2147483648, %v405_v0  ;;  %vm411_vm6 = vweird.f32 %v405_v0  ;;  %v415_v7 = vand.u32 2147483647, %v405_v0 }
 0x9c9   :  { %v418_v9 = vor.u32 1.1754944e-38, %v417_v6  ;;  %vm416_vm8 = vcmp.eq.f32.partialorder %v415_v7, 8.507059e+37 }
 0x9cd   :  { %v791_v1 = vpop.eup %790 }
 0x9ce   :  { %v407_v2 = vmul.f32 %v791_v1, %v405_v0  ;;  %vm412_vm5 = vweird.f32 %v791_v1 }
 0x9cf   :  { %vm413_vm7 = vmor %vm411_vm6, %vm412_vm5 }
 0x9d0   :  { %v408_v3 = vsub.f32 1.0, %v407_v2 }
 0x9d2   :  { %v409_v4 = vmul.f32 %v791_v1, %v408_v3 }
 0x9d4   :  { %v410_v5 = vadd.f32 %v791_v1, %v409_v4 }
 0x9d6   :  { %v414_v8 = vsel %vm413_vm7, %v791_v1, %v410_v5  ;;  %vm688_vm7 = vcmask 123904  }
 0x9d7   :  { %v419_v11 = vsel %vm416_vm8, %v418_v9, %v414_v8  ;;  %v570_v8 = vld [vmem:[#allocation4 + $0x7] ss:$8 sm:$0x3]  ;;  %vm716_vm8 = vcmask 1024  }
 0x9d8   :  { %v422_v13 = vmul.f32 %v419_v11, %v367_v53 }
 0xa1d   :  { %v425_v10 = vpop.permute.xlu2 %424 }
 0xa1e   :  { %v427_v12 = vmul.f32 %v425_v10, %v419_v11 }
 0xa20   :  { %429 = vrot.lane.b32.xlu0 %v427_v12, %s878_s30 }
 0xa92   :  { %v430_v14 = vpop.permute.xlu0 %429 }
 0xa93   :  { %v432_v15 = vadd.f32 %v430_v14, %v422_v13 }
 0xa95   :  { %792 = vtanh.f32 %v432_v15 }
 0xa9b   :  { %v793_v16 = vpop.eup %792 }
 0xa9c   :  { %435 = vrot.lane.b32.xlu1 %v793_v16, %s877_s29 }
 0xb0e   :  { %v436_v17 = vpop.permute.xlu1 %435 }
 0xb0f   :  { %v438_v18 = vmul.f32 %v436_v17, %v419_v11 }
 0xb11   :  { %442 = vrot.lane.b32.xlu2 %v438_v18, %s878_s30 }
 0xb6b   :  { %v443_v19 = vpop.permute.xlu2 %442 }
 0xb6c   :  { %736 = vmatmul.msk.f32.vlgmr.msrb.gmra.mxu3 %vm113_vm2, %v443_v19 }
 0xbef   :  { %v463_v21 = vpop.f32.mrf.mxu3 }
 0xbf0   :  { %v466_v22 = vadd.f32 %v463_v21, %v440_v20 }
 0xbf2   :  { %794 = vtanh.f32 %v466_v22  ;;  %v737_v24 = vmul.f32 -1.442695, %v466_v22 }
 0xbf4   :  { %796 = vpow2.f32 %v737_v24 }
 0xbf8   :  { %v795_v23 = vpop.eup %794 }
 0xbf9   :  { %489 = vrot.lane.b32.xlu0 %v795_v23, %s877_s29 }
 0xbfa   :  { %v797_v25 = vpop.eup %796 }
 0xbfb   :  { %v470_v26 = vadd.f32 1.0, %v797_v25 }
 0xbfd   :  { %798 = vrcp.f32 %v470_v26  ;;  %v482_v32 = vand.u32 2147483648, %v470_v26  ;;  %vm476_vm10 = vweird.f32 %v470_v26  ;;  %v480_v33 = vand.u32 2147483647, %v470_v26 }
 0xbff   :  { %v483_v35 = vor.u32 1.1754944e-38, %v482_v32  ;;  %vm481_vm12 = vcmp.eq.f32.partialorder %v480_v33, 8.507059e+37  ;;  %v651_v32 = vld [vmem:[%s1029_s4 + $0x10] sm:$0xff]  ;;  %v650_v33 = vld [vmem:[%s1029_s4 + $0x8] sm:$0xff] }
 0xc03   :  { %v799_v27 = vpop.eup %798 }
 0xc04   :  { %v472_v28 = vmul.f32 %v799_v27, %v470_v26  ;;  %vm477_vm9 = vweird.f32 %v799_v27 }
 0xc05   :  { %vm478_vm11 = vmor %vm476_vm10, %vm477_vm9 }
 0xc06   :  { %v473_v29 = vsub.f32 1.0, %v472_v28 }
 0xc08   :  { %v474_v30 = vmul.f32 %v799_v27, %v473_v29 }
 0xc0a   :  { %v475_v31 = vadd.f32 %v799_v27, %v474_v30 }
 0xc0c   :  { %v479_v34 = vsel %vm478_vm11, %v799_v27, %v475_v31  ;;  %v652_v31 = vld [vmem:[%s1029_s4 + $0x18] sm:$0xff] }
 0xc0d   :  { %v484_v37 = vsel %vm481_vm12, %v483_v35, %v479_v34  ;;  %674 = vmatpush.msra.mxu2 %v652_v31  ;;  %v649_v34 = vld [vmem:[%s1029_s4] sm:$0xff] }
 0xc0e   :  { %v487_v39 = vmul.f32 %v484_v37, %v432_v15 }
 0xc0f   :  { %675 = vmatpush.msra.mxu2 %v651_v32 }
 0xc11   :  { %676 = vmatpush.msra.mxu2 %v650_v33 }
 0xc13   :  { %677 = vmatpush.msra.mxu2 %v649_v34 }
 0xc6b   :  { %v490_v36 = vpop.permute.xlu0 %489 }
 0xc6c   :  { %v492_v38 = vmul.f32 %v490_v36, %v484_v37 }
 0xc6e   :  { %494 = vrot.lane.b32.xlu1 %v492_v38, %s878_s30 }
 0xce0   :  { %v495_v40 = vpop.permute.xlu1 %494 }
 0xce1   :  { %v497_v41 = vadd.f32 %v495_v40, %v487_v39 }
 0xce3   :  { %800 = vtanh.f32 %v497_v41 }
 0xce9   :  { %v801_v42 = vpop.eup %800 }
 0xcea   :  { %500 = vrot.lane.b32.xlu2 %v801_v42, %s877_s29 }
 0xd44   :  { %v501_v43 = vpop.permute.xlu2 %500 }
 0xd45   :  { %v503_v44 = vmul.f32 %v501_v43, %v484_v37 }
 0xd47   :  { %507 = vrot.lane.b32.xlu0 %v503_v44, %s878_s30  ;;  %v752_v44 = vld [vmem:[#allocation8] ss:$0 sm:$0xff] }
 0xdb9   :  { %v508_v45 = vpop.permute.xlu0 %507 }
 0xdba   :  { %738 = vmatmul.msk.f32.vlgmr.msrb.gmra.mxu0 %vm113_vm2, %v508_v45 }
 0xe37   :  { %v528_v47 = vpop.f32.mrf.mxu0 }
 0xe38   :  { %v531_v48 = vadd.f32 %v528_v47, %v505_v46 }
 0xe3a   :  { %802 = vtanh.f32 %v531_v48  ;;  %v739_v50 = vmul.f32 -1.442695, %v531_v48  ;;  %v753_v48 = vld [vmem:[#allocation5] ss:$0 sm:$0xff] }
 0xe3c   :  { %804 = vpow2.f32 %v739_v50 }
 0xe40   :  { %v803_v49 = vpop.eup %802 }
 0xe41   :  { %554 = vrot.lane.b32.xlu1 %v803_v49, %s877_s29 }
 0xe42   :  { %v805_v51 = vpop.eup %804 }
 0xe43   :  { %v535_v52 = vadd.f32 1.0, %v805_v51 }
 0xe45   :  { %806 = vrcp.f32 %v535_v52  ;;  %v547_v58 = vand.u32 2147483648, %v535_v52  ;;  %vm541_vm14 = vweird.f32 %v535_v52  ;;  %v545_v59 = vand.u32 2147483647, %v535_v52 }
 0xe47   :  { %v548_v61 = vor.u32 1.1754944e-38, %v547_v58  ;;  %vm546_vm1 = vcmp.eq.f32.partialorder %v545_v59, 8.507059e+37 }
 0xe4b   :  { %v807_v53 = vpop.eup %806 }
 0xe4c   :  { %v537_v54 = vmul.f32 %v807_v53, %v535_v52  ;;  %vm542_vm13 = vweird.f32 %v807_v53 }
 0xe4d   :  { %vm543_vm15 = vmor %vm541_vm14, %vm542_vm13 }
 0xe4e   :  { %v538_v55 = vsub.f32 1.0, %v537_v54 }
 0xe50   :  { %v539_v56 = vmul.f32 %v807_v53, %v538_v55 }
 0xe52   :  { %v540_v57 = vadd.f32 %v807_v53, %v539_v56 }
 0xe54   :  { %v544_v60 = vsel %vm543_vm15, %v807_v53, %v540_v57 }
 0xe55   :  { %v549_v63 = vsel %vm546_vm1, %v548_v61, %v544_v60 }
 0xe56   :  { %v552_v1 = vmul.f32 %v549_v63, %v497_v41  ;;  %v751_v41 = vld [vmem:[#allocation6] ss:$0 sm:$0xff] }
 0xeb3   :  { %v555_v62 = vpop.permute.xlu1 %554 }
 0xeb4   :  { %v557_v0 = vmul.f32 %v555_v62, %v549_v63 }
 0xeb6   :  { %559 = vrot.lane.b32.xlu2 %v557_v0, %s878_s30 }
 0xf10   :  { %v560_v2 = vpop.permute.xlu2 %559 }
 0xf11   :  { %v562_v3 = vadd.f32 %v560_v2, %v552_v1 }
 0xf13   :  { %808 = vtanh.f32 %v562_v3 }
 0xf19   :  { %v809_v4 = vpop.eup %808 }
 0xf1a   :  { %565 = vrot.lane.b32.xlu0 %v809_v4, %s877_s29 }
 0xf8c   :  { %v566_v5 = vpop.permute.xlu0 %565 }
 0xf8d   :  { %v568_v6 = vmul.f32 %v566_v5, %v549_v63 }
 0xf8f   :  { %572 = vrot.lane.b32.xlu1 %v568_v6, %s878_s30 }
0x1001   :  { %v573_v7 = vpop.permute.xlu1 %572 }
0x1002   :  { %740 = vmatmul.msk.f32.vlgmr.msra.gmra.mxu1 %vm113_vm2, %v573_v7 }
0x107f   :  { %v593_v9 = vpop.f32.mrf.mxu1 }
0x1080   :  { %v596_v10 = vadd.f32 %v593_v9, %v570_v8 }
0x1082   :  { %810 = vtanh.f32 %v596_v10  ;;  %v741_v12 = vmul.f32 -1.442695, %v596_v10 }
0x1084   :  { %812 = vpow2.f32 %v741_v12 }
0x1088   :  { %v811_v11 = vpop.eup %810 }
0x1089   :  { %619 = vrot.lane.b32.xlu2 %v811_v11, %s877_s29 }
0x108a   :  { %v813_v13 = vpop.eup %812 }
0x108b   :  { %v600_v14 = vadd.f32 1.0, %v813_v13 }
0x108d   :  { %814 = vrcp.f32 %v600_v14  ;;  %v612_v20 = vand.u32 2147483648, %v600_v14  ;;  %vm606_vm4 = vweird.f32 %v600_v14  ;;  %v610_v21 = vand.u32 2147483647, %v600_v14 }
0x108f   :  { %v613_v23 = vor.u32 1.1754944e-38, %v612_v20  ;;  %vm611_vm6 = vcmp.eq.f32.partialorder %v610_v21, 8.507059e+37 }
0x1093   :  { %v815_v15 = vpop.eup %814 }
0x1094   :  { %v602_v16 = vmul.f32 %v815_v15, %v600_v14  ;;  %vm607_vm3 = vweird.f32 %v815_v15 }
0x1095   :  { %vm608_vm5 = vmor %vm606_vm4, %vm607_vm3 }
0x1096   :  { %v603_v17 = vsub.f32 1.0, %v602_v16 }
0x1098   :  { %v604_v18 = vmul.f32 %v815_v15, %v603_v17 }
0x109a   :  { %v605_v19 = vadd.f32 %v815_v15, %v604_v18 }
0x109c   :  { %v609_v22 = vsel %vm608_vm5, %v815_v15, %v605_v19 }
0x109d   :  { %v614_v25 = vsel %vm611_vm6, %v613_v23, %v609_v22 }
0x109e   :  { %v617_v27 = vmul.f32 %v614_v25, %v562_v3 }
0x10e3   :  { %v620_v24 = vpop.permute.xlu2 %619 }
0x10e4   :  { %v622_v26 = vmul.f32 %v620_v24, %v614_v25 }
0x10e6   :  { %624 = vrot.lane.b32.xlu0 %v622_v26, %s878_s30 }
0x1158   :  { %v625_v28 = vpop.permute.xlu0 %624 }
0x1159   :  { %v627_v29 = vadd.f32 %v625_v28, %v617_v27 }
0x115b   :  { %816 = vtanh.f32 %v627_v29 }
0x1161   :  { %v817_v30 = vpop.eup %816 }
0x1162   :  { %630 = vrot.lane.b32.xlu1 %v817_v30, %s877_s29 }
0x11d4   :  { %v631_v35 = vpop.permute.xlu1 %630 }
0x11d5   :  { %v633_v36 = vmul.f32 %v631_v35, %v614_v25 }
0x11d7   :  { %v648_v37 = vmax.f32 %v633_v36, 0.0  ;;  %635 = vrot.lane.b32.xlu1 %v633_v36, %s878_s30 }
0x11d9   :  { %658 = vrot.lane.b32.xlu2 %v648_v37, %s878_s30 }
0x11e1   :  { %641 = vrot.lane.b32.xlu2 %v627_v29, %s879_s16 }
0x1233   :  { %v659_v38 = vpop.permute.xlu2 %658 }
0x1234   :  { %742 = vmatmul.msk.f32.vlgmr.msra.gmra.mxu2 %vm113_vm2, %v659_v38 }
0x123b   :  { %v642_v39 = vpop.permute.xlu2 %641 }
0x123c   :  { %644 = vst.msk [vmem:[#allocation3] sm:$0x3] %vm63_vm0, %v642_v39 }
0x1249   :  { %v636_v40 = vpop.permute.xlu1 %635 }
0x124a   :  { %639 = vst.msk [vmem:[#allocation2] sm:$0x3] %vm63_vm0, %v636_v40 }
0x12b7   :  { %v679_v42 = vpop.f32.mrf.mxu2 }
0x12b8   :  { %v680_v43 = vadd.f32 %v751_v41, %v679_v42 }
0x12ba   :  { %v682_v45 = vmax.f32 %v680_v43, 0.0 }
0x12bc   :  { %v687_v46 = vmul.f32 %v752_v44, %v682_v45 }
0x12be   :  { %v689_v47 = vsel %vm688_vm7, %v687_v46, 0.0 }
0x12bf   :  { %690 = vadd.xlane.f32.xlu0 %v689_v47 }
0x1332   :  { %v691_v49 = vpop.xlane.xlu0 %690 }
0x1333   :  { %v696_v50 = vadd.f32 %v753_v48, %v691_v49 }
0x1335   :  { %v743_v51 = vmul.f32 -1.442695, %v696_v50 }
0x1337   :  { %818 = vpow2.f32 %v743_v51 }
0x133d   :  { %v819_v52 = vpop.eup %818 }
0x133e   :  { %v700_v53 = vadd.f32 1.0, %v819_v52 }
0x1340   :  { %820 = vrcp.f32 %v700_v53  ;;  %v712_v57 = vand.u32 2147483648, %v700_v53  ;;  %v710_v59 = vand.u32 2147483647, %v700_v53  ;;  %vm706_vm2 = vweird.f32 %v700_v53 }
0x1342   :  { %v713_v61 = vor.u32 1.1754944e-38, %v712_v57  ;;  %vm711_vm10 = vcmp.eq.f32.partialorder %v710_v59, 8.507059e+37 }
0x1346   :  { %v821_v54 = vpop.eup %820 }
0x1347   :  { %v702_v55 = vmul.f32 %v821_v54, %v700_v53  ;;  %vm707_vm0 = vweird.f32 %v821_v54 }
0x1348   :  { %vm708_vm9 = vmor %vm706_vm2, %vm707_vm0 }
0x1349   :  { %v703_v56 = vsub.f32 1.0, %v702_v55 }
0x134b   :  { %v704_v58 = vmul.f32 %v821_v54, %v703_v56 }
0x134d   :  { %v705_v60 = vadd.f32 %v821_v54, %v704_v58 }
0x134f   :  { %v709_v62 = vsel %vm708_vm9, %v821_v54, %v705_v60 }
0x1350   :  { %v714_v63 = vsel %vm711_vm10, %v713_v61, %v709_v62 }
0x1351   :  { %717 = vst.msk [vmem:[%s1033_s8] sm:$0x3] %vm716_vm8, %v714_v63 }
0x1352   :  { %722 = vsyncpa [#allocation7], 1 }
0x1353   :  { %723 = vsyncpa [#allocation9], 1 }

</bundles_post_ra>
